<compile_context>
chip_gen: v7x
topology: tpu7x:2x2x1
jax: 0.10.0
libtpu: 0.0.40
codegen_flags: <defaults>
</compile_context>

<pallas_src>
import jax
import jax.numpy as jnp
from jax.experimental import pallas as pl
from jax.experimental.pallas import tpu as pltpu

_LANES = 128
_SUBLANES = 8
_TILE_ELEMS = _SUBLANES * _LANES  # 1024 f32 elements per (8,128) tile
_MAX_BLOCK_ROWS = 4096            # 4096 rows * 128 lanes * 4 B = 2 MiB / buffer


def _round_up(a, m):
    return ((a + m - 1) // m) * m


def _elementwise_kernel(x_ref, y_ref, z_ref, u_ref, v_ref):
    x = x_ref[...]
    y = y_ref[...]
    z = z_ref[...]

    x2 = x * x
    ez = jnp.exp(z)            # single exp; exp(-z) derived below
    u_ref[...] = 1.5 * x2 + jnp.sin(y) + ez
    v_ref[...] = 2.0 * x2 + jnp.cos(y) + 1.0 / ez  # exact divide (tolerance-safe)


def _tail_jnp(x, y, z):
    """Plain-jnp path for the (<1024-element) unaligned tail / tiny inputs."""
    x2 = x * x
    ez = jnp.exp(z)
    u = 1.5 * x2 + jnp.sin(y) + ez
    v = 2.0 * x2 + jnp.cos(y) + 1.0 / ez
    return u, v


def model_forward(inputs):
    """JAX/Pallas equivalent of Model.forward. inputs: dict with 'x','y','z'."""
    x, y, z = inputs["x"], inputs["y"], inputs["z"]
    orig_shape = x.shape
    dtype = x.dtype

    n = x.size
    n_main = (n // _TILE_ELEMS) * _TILE_ELEMS  # (8*128)-aligned prefix
    n_tail = n - n_main

    xf = x.reshape(-1)
    yf = y.reshape(-1)
    zf = z.reshape(-1)

    if n_main == 0:
        # Entire input is smaller than one tile: no kernel launch needed.
        u_flat, v_flat = _tail_jnp(xf, yf, zf)
    else:
        rows = n_main // _LANES  # always a multiple of 8

        # Large tiles amortize per-step overhead; cap at ~half the rows
        # (rounded to 8 sublanes) so the grid has >=2 steps and can be
        # sharded across v7x's two TensorCores.
        half_rows = _round_up(max(pl.cdiv(rows, 2), _SUBLANES), _SUBLANES)
        block_rows = min(_MAX_BLOCK_ROWS, half_rows, rows)
        grid = (pl.cdiv(rows, block_rows),)

        xs = xf[:n_main].reshape(rows, _LANES)
        ys = yf[:n_main].reshape(rows, _LANES)
        zs = zf[:n_main].reshape(rows, _LANES)

        spec = pl.BlockSpec((block_rows, _LANES), lambda i: (i, 0))
        out_sds = jax.ShapeDtypeStruct((rows, _LANES), dtype)

        u_main, v_main = pl.pallas_call(
            _elementwise_kernel,
            out_shape=(out_sds, out_sds),
            grid_spec=pltpu.PrefetchScalarGridSpec(
                num_scalar_prefetch=0,
                grid=grid,
                in_specs=[spec, spec, spec],
                out_specs=[spec, spec],
            ),
            compiler_params=pltpu.CompilerParams(
                dimension_semantics=("parallel",),
                # 5 buffers x 2 (double-buffer) x 2 MiB = 20 MiB worst case;
                # 32 MiB gives headroom and stays under v7x's 64 MiB physical.
                vmem_limit_bytes=32 * 1024 * 1024,
            ),
        )(xs, ys, zs)

        u_flat = u_main.reshape(-1)
        v_flat = v_main.reshape(-1)

        if n_tail > 0:
            # Tiny unaligned tail computed outside the kernel (avoids the
            # full-array pad/slice HBM round trips of the old version).
            u_t, v_t = _tail_jnp(xf[n_main:], yf[n_main:], zf[n_main:])
            u_flat = jnp.concatenate([u_flat, u_t])
            v_flat = jnp.concatenate([v_flat, v_t])

    u_out = u_flat.reshape(orig_shape)
    v_out = v_flat.reshape(orig_shape)
    # w == u and p == v in the reference module; alias instead of writing
    # duplicate arrays from the kernel (removes 2N of 7N HBM store traffic).
    return {"u": u_out, "v": v_out, "w": u_out, "p": v_out}


if __name__ == "__main__":
    key = jax.random.PRNGKey(0)
    kx, ky, kz = jax.random.split(key, 3)

    shape = (2, 4, 16, 16)  # B, C, H, W
    x = jax.random.normal(kx, shape, dtype=jnp.float32)
    y = jax.random.normal(ky, shape, dtype=jnp.float32)
    z = jax.random.normal(kz, shape, dtype=jnp.float32)

    inputs = {"x": x, "y": y, "z": z}
    out = model_forward(inputs)
    jax.block_until_ready(out)

    # Reference check in plain JAX.
    u_ref = 1.5 * x * x + jnp.sin(y) + jnp.exp(z)
    v_ref = 2.0 * x * x + jnp.cos(y) + jnp.exp(-z)
    assert jnp.allclose(out["u"], u_ref, atol=1e-5, rtol=1e-5)
    assert jnp.allclose(out["v"], v_ref, atol=1e-5, rtol=1e-5)
    assert jnp.allclose(out["w"], u_ref, atol=1e-5, rtol=1e-5)
    assert jnp.allclose(out["p"], v_ref, atol=1e-5, rtol=1e-5)

    print("KERNEL_OK")
</pallas_src>

<mosaic_0001>
module attributes {stable_mosaic.version = 11 : i64} {
  func.func @_elementwise_kernel(%arg0: i32, %arg1: memref<8x128xf32, #tpu.memory_space<vmem>>, %arg2: memref<8x128xf32, #tpu.memory_space<vmem>>, %arg3: memref<8x128xf32, #tpu.memory_space<vmem>>, %arg4: memref<8x128xf32, #tpu.memory_space<vmem>>, %arg5: memref<8x128xf32, #tpu.memory_space<vmem>>) attributes {dimension_semantics = [#tpu.dimension_semantics<parallel>], iteration_bounds = array<i64: 2>, scalar_prefetch = 0 : i64, scratch_operands = 0 : i64, tpu.core_type = #tpu.core_type<tc>, window_params = [{transform_indices = @transform_0, window_bounds = array<i64: 8, 128>}, {transform_indices = @transform_1, window_bounds = array<i64: 8, 128>}, {transform_indices = @transform_2, window_bounds = array<i64: 8, 128>}, {transform_indices = @transform_3, window_bounds = array<i64: 8, 128>}, {transform_indices = @transform_4, window_bounds = array<i64: 8, 128>}]} {
    %c0 = arith.constant 0 : index
    %c0_0 = arith.constant 0 : index
    %0 = vector.load %arg1[%c0, %c0_0] : memref<8x128xf32, #tpu.memory_space<vmem>>, vector<8x128xf32>
    %c0_1 = arith.constant 0 : index
    %c0_2 = arith.constant 0 : index
    %1 = vector.load %arg2[%c0_1, %c0_2] : memref<8x128xf32, #tpu.memory_space<vmem>>, vector<8x128xf32>
    %c0_3 = arith.constant 0 : index
    %c0_4 = arith.constant 0 : index
    %2 = vector.load %arg3[%c0_3, %c0_4] : memref<8x128xf32, #tpu.memory_space<vmem>>, vector<8x128xf32>
    %3 = arith.mulf %0, %0 : vector<8x128xf32>
    %4 = math.exp %2 : vector<8x128xf32>
    %cst = arith.constant 1.500000e+00 : f32
    %5 = vector.broadcast %cst : f32 to vector<8x128xf32>
    %6 = arith.mulf %5, %3 : vector<8x128xf32>
    %7 = math.sin %1 : vector<8x128xf32>
    %8 = arith.addf %6, %7 : vector<8x128xf32>
    %9 = arith.addf %8, %4 : vector<8x128xf32>
    %c0_5 = arith.constant 0 : index
    %c0_6 = arith.constant 0 : index
    %10 = vector.load %arg4[%c0_5, %c0_6] : memref<8x128xf32, #tpu.memory_space<vmem>>, vector<8x128xf32>
    tpu.vector_store %arg4[%c0_5, %c0_6], %9 {strides = array<i32>} : memref<8x128xf32, #tpu.memory_space<vmem>>, vector<8x128xf32>,
    %cst_7 = arith.constant 2.000000e+00 : f32
    %11 = vector.broadcast %cst_7 : f32 to vector<8x128xf32>
    %12 = arith.mulf %11, %3 : vector<8x128xf32>
    %13 = math.cos %1 : vector<8x128xf32>
    %14 = arith.addf %12, %13 : vector<8x128xf32>
    %cst_8 = arith.constant 1.000000e+00 : f32
    %15 = vector.broadcast %cst_8 : f32 to vector<8x128xf32>
    %16 = arith.divf %15, %4 : vector<8x128xf32>
    %17 = arith.addf %14, %16 : vector<8x128xf32>
    %c0_9 = arith.constant 0 : index
    %c0_10 = arith.constant 0 : index
    %18 = vector.load %arg5[%c0_9, %c0_10] : memref<8x128xf32, #tpu.memory_space<vmem>>, vector<8x128xf32>
    tpu.vector_store %arg5[%c0_9, %c0_10], %17 {strides = array<i32>} : memref<8x128xf32, #tpu.memory_space<vmem>>, vector<8x128xf32>,
    return
  }
  func.func @transform_0(%arg0: i32) -> (i32, i32) {
    %c0_i32 = arith.constant 0 : i32
    %c0_i32_0 = arith.constant 0 : i32
    return %arg0, %c0_i32 : i32, i32
  }
  func.func @transform_1(%arg0: i32) -> (i32, i32) {
    %c0_i32 = arith.constant 0 : i32
    %c0_i32_0 = arith.constant 0 : i32
    return %arg0, %c0_i32 : i32, i32
  }
  func.func @transform_2(%arg0: i32) -> (i32, i32) {
    %c0_i32 = arith.constant 0 : i32
    %c0_i32_0 = arith.constant 0 : i32
    return %arg0, %c0_i32 : i32, i32
  }
  func.func @transform_3(%arg0: i32) -> (i32, i32) {
    %c0_i32 = arith.constant 0 : i32
    %c0_i32_0 = arith.constant 0 : i32
    return %arg0, %c0_i32 : i32, i32
  }
  func.func @transform_4(%arg0: i32) -> (i32, i32) {
    %c0_i32 = arith.constant 0 : i32
    %c0_i32_0 = arith.constant 0 : i32
    return %arg0, %c0_i32 : i32, i32
  }
}

</mosaic_0001>

<bundles_post_ra>
// kernel: tpu_custom_call.1
= control target key start
LH: loop header
LB: loop body
LE: loop exit
PB: predicated region body
PF: predicated region fallthrough
CT: control target
= control target key end

     0   :  { %s1325_s0 = inlined_call_operand.hbm [shape: f32[16,128], index: 0, kind: input, shape index: {}]   ;;  %s1326_s1 = inlined_call_operand.hbm [shape: f32[16,128], index: 1, kind: input, shape index: {}]   ;;  %s1327_s2 = inlined_call_operand.hbm [shape: f32[16,128], index: 2, kind: input, shape index: {}]   ;;  %s1328_s3 = inlined_call_operand.hbm [shape: f32[16,128], index: 3, kind: output, shape index: {0}]   ;;  %s1329_s4 = inlined_call_operand.hbm [shape: f32[16,128], index: 4, kind: output, shape index: {1}]  }
   0x1   :  { %1334 = sst [smem:[#allocation16_spill]] %s1326_s1 }
   0x2   :  { %10 = vsyncpa [#allocation3], 0 }
   0x3   :  { %12 = vsyncpa [#allocation3 + $0x1], 0 }
   0x4   :  { %13 = vsyncpa [#allocation6], 0 }
   0x5   :  { %15 = vsyncpa [#allocation6 + $0x1], 0 }
   0x6   :  { %16 = vsyncpa [#allocation4], 0 }
   0x7   :  { %18 = vsyncpa [#allocation4 + $0x1], 0 }
   0x8   :  { %19 = vsyncpa [#allocation10], 0 }
   0x9   :  { %21 = vsyncpa [#allocation10 + $0x1], 0  ;;  %s1033_s15 = smov 0   ;;  %s1035_s16 = smov 0  }
   0xa   :  { %s1037_s17 = smov 0   ;;  %s1039_s18 = smov 0  }
   0xb LB: > { %s1054_s19 = sadd.s32 4294967295, %s995_s18   ;;  %s695_s20 = sadd.s32 4294967294, %s995_s18   ;;  %s995_s18 = sphi %s1039_s18, %s1355_s18   ;;  %s991_s17 = sphi %s1037_s17, %s1354_s17   ;;  %s987_s16 = sphi %s1035_s16, %s1353_s16   ;;  %s983_s15 = sphi %s1033_s15, %s1352_s15  }
   0xc   : > { %s1058_s21 = sadd.s32 1, %s995_s18   ;;  %s34_s22 = sadd.s32 1, %s991_s17 }
   0xd   : > { %s31_s23 = ssub.s32 %s995_s18, %s1058_s21  ;;  %p41_p0 = scmp.ne.s32.totalorder %s991_s17, %s987_s16 }
   0xe   : > { %p32_p1 = scmp.eq.s32.totalorder %s31_s23, 0  ;;  %p42_p2 = scmp.eq.s32.totalorder %s995_s18, 0 }
   0xf   : > { %p47_p3 = scmp.ne.s32.totalorder %s987_s16, %s983_s15  ;;  %p48_p4 = scmp.eq.s32.totalorder %s1054_s19, 0 }
  0x10   : > { %s1070_s24 = scalar_select %p32_p1, %s991_s17, %s34_s22  }
  0x11   : > { %p43_p5 = por %p42_p2, %p41_p0  ;;  %p1072_p6 = por %p48_p4, %p47_p3 }
  0x12   : > { %1335 = sst [smem:[#allocation15_spill]] %s1070_s24  ;;  %p123_p7 = scmp.eq.s32.totalorder %s1054_s19, 1 }
  0x13   : > { %s1336_s25 = scalar_select %p1072_p6, 1, 0 }
  0x14   : > { %p129_p8 = scmp.eq.s32.totalorder %s695_s20, 1  ;;  %p755_p10 = scmp.lt.s32.totalorder %s995_s18, 2 }
  0x15   : > { %p1079_p11 = por %p123_p7, %p41_p0  ;;  %s175_s28 = sand.u32 1, %s991_s17  }
  0x16   : > { %p1083_p12 = por %p129_p8, %p47_p3  ;;  %s1089_s29 = sshll.u32 %s995_s18, 7 }
  0x17   : > { %s1337_s26 = scalar_select %p1079_p11, 1, 0 }
  0x18   : > { %s1338_s27 = scalar_select %p1083_p12, 1, 0 }
  0x19   : > { %s1093_s30 = sshll.u32 %s175_s28, 3  ;;  %p1095_p13 = pnand %p755_p10, %p43_p5 }
  0x1a   : > { %s193_s6 = sand.u32 1, %s995_s18   ;;  %s1340_s1 = sld [smem:[#allocation16_spill]] }
  0x1b   : > { %s1339_s5 = scalar_select %p1095_p13, 1, 0 }
  0x1c   : > { %s197_s10 = scalar_lea.vmem [#allocation5], %s1093_s30  ;;  %s1110_s12 = scalar_lea.sflag [#allocation6], %s193_s6 }
  0x1d   : > { %s204_s11 = sshll.u32 %s197_s10, 4  ;;  %p1116_p2 = pneg %p1095_p13  ;;  %s1107_s11 = int_to_ptr.vmem [resolvable:$true] %s204_s11 }
  0x20   : > { %s1104_s9 = scalar_lea.hbm %s1340_s1, %s1089_s29  ;;  %s808_s23 = scalar_lea.hbm %s1340_s1, 256 }
  0x21   : > { %s803_s13 = scalar_lea.hbm %s1104_s9, 128  ;;  %p809_p5 = scmp.lt.u32.totalorder %s1104_s9, %s1340_s1 }
  0x22   : > { %p804_p1 = scmp.ne.s32.totalorder %s1104_s9, %s803_s13  ;;  %p810_p7 = scmp.lt.u32.totalorder %s808_s23, %s803_s13 }
  0x23   : > { %p812_p10 = scmp.lt.u32.totalorder %s803_s13, %s1104_s9 }
  0x24   : > { %p806_p3 = pnand %p1116_p2, %p804_p1  ;;  %p811_p8 = por %p810_p7, %p809_p5 }
  0x26   : > { %p807_p4 = pneg %p806_p3  ;;  %p813_p9 = por %p812_p10, %p811_p8 }
  0x28   : > { %p814_p0 = pnand %p813_p9, %p807_p4 }
  0x2a   : > { %817 = shalt.err (!%p814_p0)
}
  0x2b   : > { %s818_s6 = scalar_lea.vmem %s1107_s11, 128  ;;  %s997_s10 = smov [#allocation5]  }
  0x2c   : > { %p819_p1 = scmp.ne.s32.totalorder %s1107_s11, %s818_s6  ;;  %s823_s20 = sshll.u32 %s997_s10, 4  ;;  %s824_s20 = int_to_ptr.vmem [resolvable:$false] %s823_s20 }
  0x2d   : > { %s825_s22 = scalar_lea.vmem %s824_s20, 256  ;;  %p826_p11 = scmp.lt.s32.totalorder %s1107_s11, %s824_s20 }
  0x2e   : > { %p821_p3 = pnand %p819_p1, %p1116_p2  ;;  %p827_p6 = scmp.lt.s32.totalorder %s825_s22, %s818_s6 }
  0x30   : > { %p822_p12 = pneg %p821_p3  ;;  %p828_p5 = por %p827_p6, %p826_p11 }
  0x32   : > { %p829_p7 = pnand %p828_p5, %p822_p12 }
  0x34   : > { %832 = shalt.err (!%p829_p7)
}
  0x35   : > { %744 = dma.hbm_to_vmem [thread:$0]  (!%p1095_p13), %s1104_s9, 128, %s1107_s11, %s1110_s12  }
  0x36   : > { %p227_p9 = scmp.lt.s32.totalorder %s995_s18, 3  ;;  %s1145_s7 = scalar_lea.hbm %s1325_s0, %s1089_s29 }
  0x37   : > { %p1342_p6 = scmp.ge.s32.totalorder %s995_s18, 1  ;;  %s179_s6 = scalar_lea.vmem [#allocation2], %s1093_s30 }
  0x38   : > { %s186_s10 = sshll.u32 %s179_s6, 4  ;;  %s176_s9 = scalar_lea.sflag [#allocation3], %s175_s28  ;;  %s187_s10 = int_to_ptr.vmem [resolvable:$true] %s186_s10 }
  0x39   : > { %p1149_p11 = pnand %p1342_p6, %p227_p9  ;;  %s833_s11 = scalar_lea.hbm %s1145_s7, 128 }
  0x3a   : > { %p834_p12 = scmp.ne.s32.totalorder %s1145_s7, %s833_s11  ;;  %s838_s13 = scalar_lea.hbm %s1325_s0, 256 }
  0x3b   : > { %s1343_s8 = scalar_select %p1149_p11, 1, 0 }
  0x3c   : > { %p836_p0 = pnand %p834_p12, %p1116_p2  ;;  %p839_p8 = scmp.lt.u32.totalorder %s1145_s7, %s1325_s0 }
  0x3d   : > { %p840_p10 = scmp.lt.u32.totalorder %s838_s13, %s833_s11  ;;  %p842_p3 = scmp.lt.u32.totalorder %s833_s11, %s1145_s7 }
  0x3e   : > { %p837_p4 = pneg %p836_p0 }
  0x3f   : > { %p841_p1 = por %p840_p10, %p839_p8 }
  0x41   : > { %p843_p5 = por %p842_p3, %p841_p1 }
  0x43   : > { %p844_p7 = pnand %p843_p5, %p837_p4 }
  0x45   : > { %847 = shalt.err (!%p844_p7)
}
  0x46   : > { %s848_s28 = scalar_lea.vmem %s187_s10, 128  ;;  %s998_s6 = smov [#allocation2]  }
  0x47   : > { %p849_p9 = scmp.ne.s32.totalorder %s187_s10, %s848_s28  ;;  %s853_s24 = sshll.u32 %s998_s6, 4  ;;  %s854_s24 = int_to_ptr.vmem [resolvable:$false] %s853_s24 }
  0x48   : > { %s855_s20 = scalar_lea.vmem %s854_s24, 256  ;;  %p856_p0 = scmp.lt.s32.totalorder %s187_s10, %s854_s24 }
  0x49   : > { %p851_p6 = pnand %p849_p9, %p1116_p2  ;;  %p857_p11 = scmp.lt.s32.totalorder %s855_s20, %s848_s28 }
  0x4b   : > { %p852_p12 = pneg %p851_p6  ;;  %p858_p13 = por %p857_p11, %p856_p0 }
  0x4d   : > { %p859_p8 = pnand %p858_p13, %p852_p12 }
  0x4f   : > { %862 = shalt.err (!%p859_p8)
}
  0x50   : > { %p1344_p10 = scmp.ne.s32.totalorder %s1339_s5, 0  ;;  %s1177_s22 = scalar_lea.hbm %s1327_s2, %s1089_s29 }
  0x51   : > { %s215_s24 = scalar_lea.vmem [#allocation7], %s1093_s30  ;;  %s863_s23 = scalar_lea.hbm %s1177_s22, 128 }
  0x52   : > { %741 = dma.hbm_to_vmem [thread:$0]  (!%p1344_p10), %s1145_s7, 128, %s187_s10, %s176_s9  }
  0x53   : > { %s222_s13 = sshll.u32 %s215_s24, 4  ;;  %p864_p13 = scmp.ne.s32.totalorder %s1177_s22, %s863_s23  ;;  %s223_s13 = int_to_ptr.vmem [resolvable:$true] %s222_s13 }
  0x54   : > { %s868_s7 = scalar_lea.hbm %s1327_s2, 256  ;;  %p869_p1 = scmp.lt.u32.totalorder %s1177_s22, %s1327_s2 }
  0x55   : > { %p866_p11 = pnand %p864_p13, %p1116_p2  ;;  %p870_p3 = scmp.lt.u32.totalorder %s868_s7, %s863_s23 }
  0x56   : > { %p872_p7 = scmp.lt.u32.totalorder %s863_s23, %s1177_s22 }
  0x57   : > { %p867_p4 = pneg %p866_p11  ;;  %p871_p5 = por %p870_p3, %p869_p1 }
  0x59   : > { %p873_p9 = por %p872_p7, %p871_p5 }
  0x5b   : > { %p874_p6 = pnand %p873_p9, %p867_p4 }
  0x5d   : > { %877 = shalt.err (!%p874_p6)
}
  0x5e   : > { %s878_s29 = scalar_lea.vmem %s223_s13, 128  ;;  %s999_s30 = smov [#allocation7]  }
  0x5f   : > { %p879_p12 = scmp.ne.s32.totalorder %s223_s13, %s878_s29  ;;  %s883_s20 = sshll.u32 %s999_s30, 4  ;;  %s884_s20 = int_to_ptr.vmem [resolvable:$false] %s883_s20 }
  0x60   : > { %s885_s1 = scalar_lea.vmem %s884_s20, 256  ;;  %p886_p13 = scmp.lt.s32.totalorder %s223_s13, %s884_s20 }
  0x61   : > { %p881_p0 = pnand %p879_p12, %p1116_p2  ;;  %p887_p11 = scmp.lt.s32.totalorder %s885_s1, %s878_s29 }
  0x63   : > { %p882_p8 = pneg %p881_p0  ;;  %p888_p10 = por %p887_p11, %p886_p13 }
  0x65   : > { %p889_p1 = pnand %p888_p10, %p882_p8 }
  0x67   : > { %892 = shalt.err (!%p889_p1)
}
  0x68   : > { %p1345_p3 = scmp.ne.s32.totalorder %s1339_s5, 0  ;;  %p1346_p4 = scmp.ne.s32.totalorder %s1343_s8, 0 }
  0x69   : > { %s1201_s14 = sand.u32 (!%p1346_p4), 1, %s987_s16   ;;  %p1347_p2 = scmp.ne.s32.totalorder (!%p1346_p4), %s1336_s25, 0 }
  0x6a   : > { %747 = dma.hbm_to_vmem [thread:$0]  (!%p1345_p3), %s1177_s22, 128, %s223_s13, %s1110_s12  }
  0x6b   : > { %231 = sbr.rel (%p1346_p4) target bundleno = 240 (0xf0), region = 32  ;;  %s1204_s11 = sshll.u32 (!%p1346_p4), %s1201_s14, 3 }
  0x6c   : > { %s234_s24 = scalar_lea.sflag (!%p1346_p4), [#allocation3], %s1201_s14  ;;  %s237_s23 = scalar_lea.vmem (!%p1346_p4), [#allocation2], %s1204_s11 }
  0x72   : > { %966 = dma.done.wait (%p1347_p2), %s234_s24, 128  }
  0x73   : > { %968 = vsyncadd (%p1347_p2), %s234_s24, 4294967168  ;;  %s242_s5 = sand.u32 1, %s1054_s19   ;;  %s246_s8 = scalar_lea.vmem [#allocation5], %s1204_s11 }
  0x74   : > { %s243_s12 = scalar_lea.sflag [#allocation6], %s242_s5 }
  0x75   : > { %970 = dma.done.wait (%p1347_p2), %s243_s12, 256  }
  0x76   : > { %972 = vsyncadd (%p1347_p2), %s243_s12, 4294967040  ;;  %v1218_v0 = vld [vmem:[%s246_s8] sm:$0xff]  ;;  %v1000_v12 = vmov 683565275   ;;  %v1001_v14 = vmov 2475754826  }
  0x77   : > { %v305_v1 = vand.u32 2139095040, %v1218_v0  ;;  %v302_v3 = vand.u32 2147483647, %v1218_v0  ;;  %v1002_v16 = vmov 2131351028   ;;  %s255_s25 = scalar_lea.vmem [#allocation7], %s1204_s11  ;;  %vm394_vm13 = vweird.f32 %v1218_v0 }
  0x78   : > { %v1003_v18 = vmov 2102212464   ;;  %v1004_v20 = vmov 920167782   ;;  %v1005_v27 = vmov 1326507024  }
  0x79   : > { %v306_v2 = vshrl.u32 %v305_v1, 23  ;;  %v309_v6 = vand.u32 8388607, %v302_v3  ;;  %vm304_vm7 = vcmp.lt.s32.totalorder %v1218_v0, 0  ;;  %vm303_vm8 = vcmp.le.f32.partialorder %v302_v3, 0.7853982 }
  0x7a   : > { %s287_s22 = scalar_lea.vmem [#allocation8], %s1204_s11  ;;  %s294_s28 = scalar_lea.vmem [#allocation9], %s1204_s11 }
  0x7b   : > { %v710_v4 = vadd.s32 4294967169, %v306_v2  ;;  %v310_v9 = vor.u32 8388608, %v309_v6  ;;  %v297_v6 = vld [vmem:[%s255_s25] sm:$0xff]  ;;  %s537_s13 = sshll.u32 %s287_s22, 4  ;;  %s550_s6 = sshll.u32 %s294_s28, 4  ;;  %s1249_s13 = int_to_ptr.vmem [resolvable:$true] %s537_s13  ;;  %s1251_s6 = int_to_ptr.vmem [resolvable:$true] %s550_s6 }
  0x7c   : > { %s720_s7 = sshll.u32 %s1054_s19, 7  ;;  %s519_s1 = scalar_lea.sflag [#allocation4], %s1201_s14 }
  0x7d   : > { %v312_v5 = vadd.s32 1, %v710_v4  ;;  %v350_v29 = vshll.u32 %v310_v9, 8  ;;  %s1256_s29 = scalar_lea.hbm %s1328_s3, %s720_s7  ;;  %s1261_s19 = scalar_lea.hbm %s1329_s4, %s720_s7 }
  0x7e   : > { %s893_s11 = scalar_lea.vmem %s1249_s13, 128  ;;  %p1348_p5 = scmp.ne.s32.totalorder %s1337_s26, 0 }
  0x7f   : > { %vm313_vm0 = vcmp.gt.s32.totalorder %v312_v5, 0  ;;  %p894_p10 = scmp.ne.s32.totalorder %s1249_s13, %s893_s11  ;;  %s1006_s24 = smov [#allocation8]  }
  0x80   : > { %v314_v7 = vsel %vm313_vm0, %v312_v5, 0 }
  0x81   : > { %v316_v8 = vand.u32 31, %v314_v7  ;;  %v315_v10 = vshrl.u32 %v314_v7, 5  ;;  %p895_p7 = pnand %p894_p10, %p1348_p5 }
  0x83   : > { %v317_v11 = vsub.s32 32, %v316_v8  ;;  %v319_v13 = vshll.u32 %v1000_v12, %v316_v8  ;;  %v322_v15 = vshll.u32 %v1001_v14, %v316_v8  ;;  %v325_v17 = vshll.u32 %v1002_v16, %v316_v8  ;;  %p896_p9 = pneg %p895_p7 }
  0x84   : > { %v328_v19 = vshll.u32 %v1003_v18, %v316_v8  ;;  %v331_v21 = vshll.u32 %v1004_v20, %v316_v8  ;;  %vm334_vm1 = vcmp.lt.s32.totalorder %v315_v10, 1  ;;  %vm337_vm2 = vcmp.lt.s32.totalorder %v315_v10, 4 }
  0x85   : > { %v318_v22 = vshrl.u32 %v1000_v12, %v317_v11  ;;  %v320_v23 = vshrl.u32 %v1001_v14, %v317_v11  ;;  %v323_v24 = vshrl.u32 %v1002_v16, %v317_v11  ;;  %v326_v25 = vshrl.u32 %v1003_v18, %v317_v11 }
  0x86   : > { %v329_v26 = vshrl.u32 %v1004_v20, %v317_v11  ;;  %v332_v28 = vshrl.u32 %v1005_v27, %v317_v11  ;;  %vm335_vm3 = vcmp.lt.s32.totalorder %v315_v10, 2  ;;  %vm336_vm4 = vcmp.lt.s32.totalorder %v315_v10, 3 }
  0x87   : > { %v321_v30 = vor.u32 %v320_v23, %v319_v13  ;;  %v324_v31 = vor.u32 %v323_v24, %v322_v15  ;;  %v327_v32 = vor.u32 %v326_v25, %v325_v17  ;;  %v299_v11 = vmul.f32 1.442695, %v297_v6  ;;  %v295_v24 = vld [vmem:[%s237_s23] sm:$0xff]  ;;  %s897_s23 = sshll.u32 %s1006_s24, 4  ;;  %s898_s23 = int_to_ptr.vmem [resolvable:$false] %s897_s23 }
  0x88   : > { %v330_v33 = vor.u32 %v329_v26, %v328_v19  ;;  %v333_v34 = vor.u32 %v332_v28, %v331_v21  ;;  %v298_v27 = vmul.f32 %v295_v24, %v295_v24  ;;  %s899_s5 = scalar_lea.vmem %s898_s23, 256  ;;  %p900_p6 = scmp.lt.s32.totalorder %s1249_s13, %s898_s23 }
  0x89   : > { %v338_v35 = vsel %vm334_vm1, %v318_v22, %v321_v30  ;;  %v339_v36 = vsel %vm337_vm2, %v327_v32, 2102212464  ;;  %v342_v37 = vsel %vm334_vm1, %v321_v30, %v324_v31  ;;  %v346_v38 = vsel %vm334_vm1, %v324_v31, %v327_v32  ;;  %p901_p12 = scmp.lt.s32.totalorder %s899_s5, %s893_s11 }
  0x8a   : > { %v340_v39 = vsel %vm336_vm4, %v324_v31, %v339_v36  ;;  %v343_v40 = vsel %vm337_vm2, %v330_v33, 920167782  ;;  %v347_v41 = vsel %vm337_vm2, %v333_v34, 1326507024  ;;  %795 = vpow2.f32 %v299_v11 }
  0x8b   : > { %v344_v42 = vsel %vm336_vm4, %v327_v32, %v343_v40  ;;  %v348_v43 = vsel %vm336_vm4, %v330_v33, %v347_v41  ;;  %v341_v44 = vsel %vm335_vm3, %v338_v35, %v340_v39  ;;  %v301_v31 = vmul.f32 1.5, %v298_v27  ;;  %p902_p0 = por %p901_p12, %p900_p6 }
  0x8c   : > { %v345_v45 = vsel %vm335_vm3, %v342_v37, %v344_v42  ;;  %v349_v46 = vsel %vm335_vm3, %v346_v38, %v348_v43  ;;  %v357_v51 = vmul.u32 %v350_v29, %v341_v44  ;;  %v409_v33 = vmul.f32 2.0, %v298_v27 }
  0x8d   : > { %v1224_v47 = vmul.u32.u64.low %v350_v29, %v349_v46  ;;  %v1225_v48 = vmul.u32.u64.high %v350_v29, %v349_v46, %v1224_v47  ;;  %v1227_v49 = vmul.u32.u64.low %v350_v29, %v345_v45  ;;  %v1228_v50 = vmul.u32.u64.high %v350_v29, %v345_v45, %v1227_v49  ;;  %p903_p8 = pnand %p902_p0, %p896_p9 }
  0x8f   : > { %vm359_vm5 = vc.u32 %v1225_v48, %v1227_v49  ;;  %v360_v52 = vadd.s32 1, %v1228_v50  ;;  %v358_v63 = vadd.s32 %v1227_v49, %v1225_v48 }
  0x91   : > { %v361_v53 = vsel %vm359_vm5, %v360_v52, %v1228_v50 }
  0x92   : > { %v362_v54 = vadd.s32 %v361_v53, %v357_v51 }
  0x94   : > { %v363_v55 = vadd.s32 536870912, %v362_v54  ;;  %v796_v23 = vpop.eup %795 }
  0x96   : > { %v364_v56 = vshrl.u32 %v363_v55, 30 }
  0x98   : > { %v365_v57 = vshll.u32 %v364_v56, 30  ;;  %v388_v15 = vsub.s32 4, %v364_v56 }
  0x9a   : > { %v366_v58 = vsub.s32 %v362_v54, %v365_v57  ;;  %v389_v18 = vsel %vm304_vm7, %v388_v15, %v364_v56 }
  0x9b   : > { %v391_v21 = vsel %vm303_vm8, 0, %v389_v18 }
  0x9c   : > { %v368_v59 = vsub.s32 0, %v366_v58  ;;  %v395_v22 = vadd.s32 3, %v391_v21  ;;  %v503_v26 = vand.u32 3, %v391_v21 }
  0x9e   : > { %v711_v60 = vmin.u32 %v368_v59, %v366_v58  ;;  %v396_v25 = vand.u32 3, %v395_v22  ;;  %vm508_vm10 = vcmp.eq.s32.totalorder %v503_v26, 2  ;;  %vm505_vm12 = vcmp.eq.s32.totalorder %v503_v26, 0 }
  0x9f   : > { %vm504_vm15 = vcmp.lt.s32.totalorder %v503_v26, 2 }
  0xa0   : > { %v370_v61 = vclz %v711_v60  ;;  %vm401_vm9 = vcmp.eq.s32.totalorder %v396_v25, 2  ;;  %vm398_vm11 = vcmp.eq.s32.totalorder %v396_v25, 0  ;;  %vm397_vm14 = vcmp.lt.s32.totalorder %v396_v25, 2 }
  0xa2   : > { %v712_v62 = vadd.s32 4294967294, %v370_v61 }
  0xa4   : > { %vm713_vm6 = vcmp.lt.s32.totalorder %v712_v62, 0 }
  0xa5   : > { %v373_v1 = vsel %vm713_vm6, 0, %v712_v62 }
  0xa6   : > { %v374_v2 = vsub.s32 32, %v373_v1  ;;  %v375_v4 = vshll.u32 %v366_v58, %v373_v1  ;;  %v378_v5 = vsub.s32 4294967266, %v373_v1 }
  0xa8   : > { %v376_v7 = vshrl.u32 %v358_v63, %v374_v2  ;;  %v379_v8 = vadd.s32 127, %v378_v5 }
  0xaa   : > { %v377_v9 = vor.u32 %v376_v7, %v375_v4  ;;  %v380_v10 = vshll.u32 %v379_v8, 23 }
  0xac   : > { %v381_v12 = vor.u32 4788187, %v380_v10  ;;  %v384_v13 = vcvt.s32.f32 %v377_v9 }
  0xae   : > { %v382_v14 = vand.u32 2147483647, %v381_v12 }
  0xb0   : > { %v385_v16 = vmul.f32 %v384_v13, %v382_v14 }
  0xb2   : > { %v386_v17 = vxor.u32 2147483648, %v385_v16 }
  0xb4   : > { %v387_v19 = vsel %vm304_vm7, %v386_v17, %v385_v16 }
  0xb5   : > { %v390_v20 = vsel %vm303_vm8, %v1218_v0, %v387_v19 }
  0xb6   : > { %797 = vcosq.f32 %v390_v20 }
  0xb7   : > { %799 = vsinq.f32 %v390_v20 }
  0xb8   : > { %801 = vrcp.f32 %v796_v23 }
  0xc0   : > { %v798_v28 = vpop.eup %797 }
  0xc1   : > { %v800_v3 = vpop.eup %799  ;;  %v402_v29 = vxor.u32 2147483648, %v798_v28 }
  0xc2   : > { %v399_v30 = vxor.u32 2147483648, %v800_v3  ;;  %v802_v39 = vpop.eup %801 }
  0xc3   : > { %v403_v32 = vsel %vm401_vm9, %v402_v29, %v800_v3  ;;  %v510_v34 = vsel %vm508_vm10, %v402_v29, %v800_v3 }
  0xc4   : > { %v400_v35 = vsel %vm398_vm11, %v798_v28, %v399_v30  ;;  %v507_v36 = vsel %vm505_vm12, %v798_v28, %v399_v30 }
  0xc5   : > { %v404_v37 = vsel %vm397_vm14, %v400_v35, %v403_v32  ;;  %v511_v38 = vsel %vm504_vm15, %v507_v36, %v510_v34 }
  0xc6   : > { %v405_v40 = vsel %vm394_vm13, nan, %v404_v37  ;;  %v512_v41 = vsel %vm394_vm13, nan, %v511_v38 }
  0xc7   : > { %v406_v42 = vadd.f32 %v405_v40, %v301_v31  ;;  %v513_v43 = vadd.f32 %v512_v41, %v409_v33 }
  0xc9   : > { %v407_v44 = vadd.f32 %v796_v23, %v406_v42  ;;  %v516_v45 = vadd.f32 %v802_v39, %v513_v43 }
  0xcb   : > { %408 = vst [vmem:[%s287_s22] sm:$0xff] %v407_v44  ;;  %517 = vst [vmem:[%s294_s28] sm:$0xff] %v516_v45 }
  0xcc   : > { %906 = shalt.err (!%p903_p8)
}
  0xcd   : > { %s907_s12 = scalar_lea.hbm %s1256_s29, 128  ;;  %s911_s22 = scalar_lea.hbm %s1328_s3, 256 }
  0xce   : > { %p908_p13 = scmp.ne.s32.totalorder %s1256_s29, %s907_s12  ;;  %p912_p3 = scmp.lt.u32.totalorder %s1256_s29, %s1328_s3 }
  0xcf   : > { %p913_p4 = scmp.lt.u32.totalorder %s911_s22, %s907_s12  ;;  %p915_p10 = scmp.lt.u32.totalorder %s907_s12, %s1256_s29 }
  0xd0   : > { %p909_p11 = pnand %p908_p13, %p1348_p5 }
  0xd1   : > { %p914_p2 = por %p913_p4, %p912_p3 }
  0xd2   : > { %p910_p1 = pneg %p909_p11 }
  0xd3   : > { %p916_p7 = por %p915_p10, %p914_p2 }
  0xd5   : > { %p917_p9 = pnand %p916_p7, %p910_p1 }
  0xd7   : > { %920 = shalt.err (!%p917_p9)
}
  0xd8   : > { %734 = dma.vmem_to_hbm [thread:$0]  (%p1348_p5), %s1249_s13, 128, %s1256_s29, %s519_s1  }
  0xd9   : > { %s524_s10 = scalar_lea.sflag [#allocation10], %s1201_s14  ;;  %s921_s9 = scalar_lea.vmem %s1251_s6, 128 }
  0xda   : > { %p922_p6 = scmp.ne.s32.totalorder %s1251_s6, %s921_s9  ;;  %s1007_s30 = smov [#allocation9]  }
  0xdb   : > { %s925_s20 = sshll.u32 %s1007_s30, 4  ;;  %s926_s20 = int_to_ptr.vmem [resolvable:$false] %s925_s20 }
  0xdc   : > { %p923_p12 = pnand %p922_p6, %p1348_p5  ;;  %s927_s11 = scalar_lea.vmem %s926_s20, 256 }
  0xdd   : > { %p928_p8 = scmp.lt.s32.totalorder %s1251_s6, %s926_s20  ;;  %p929_p13 = scmp.lt.s32.totalorder %s927_s11, %s921_s9 }
  0xde   : > { %p924_p0 = pneg %p923_p12 }
  0xdf   : > { %p930_p11 = por %p929_p13, %p928_p8 }
  0xe1   : > { %p931_p1 = pnand %p930_p11, %p924_p0 }
  0xe3   : > { %934 = shalt.err (!%p931_p1)
}
  0xe4   : > { %s935_s14 = scalar_lea.hbm %s1261_s19, 128  ;;  %s939_s1 = scalar_lea.hbm %s1329_s4, 256 }
  0xe5   : > { %p936_p3 = scmp.ne.s32.totalorder %s1261_s19, %s935_s14  ;;  %p940_p10 = scmp.lt.u32.totalorder %s1261_s19, %s1329_s4 }
  0xe6   : > { %p941_p7 = scmp.lt.u32.totalorder %s939_s1, %s935_s14  ;;  %p943_p6 = scmp.lt.u32.totalorder %s935_s14, %s1261_s19 }
  0xe7   : > { %p937_p4 = pnand %p936_p3, %p1348_p5 }
  0xe8   : > { %p942_p9 = por %p941_p7, %p940_p10 }
  0xe9   : > { %p938_p2 = pneg %p937_p4 }
  0xea   : > { %p944_p12 = por %p943_p6, %p942_p9 }
  0xec   : > { %p945_p0 = pnand %p944_p12, %p938_p2 }
  0xee   : > { %948 = shalt.err (!%p945_p0)
}
  0xef   : > { %735 = dma.vmem_to_hbm [thread:$0]  (%p1348_p5), %s1251_s6, 128, %s1261_s19, %s524_s10  }
  0xf0 PF: > { %s562_s5 = sand.u32 1, %s983_s15   ;;  %p1349_p8 = scmp.ne.s32.totalorder %s1338_s27, 0 }
  0xf1   : > { %p1350_p13 = scmp.ge.s32.totalorder %s995_s18, 2  ;;  %s563_s12 = scalar_lea.sflag [#allocation4], %s562_s5 }
  0xf3   : > { %p749_p11 = pnand %p1350_p13, %p1349_p8 }
  0xf5   : > { %974 = dma.done.wait (!%p749_p11), %s563_s12, 128  }
  0xf6   : > { %976 = vsyncadd (!%p749_p11), %s563_s12, 4294967168  ;;  %s572_s8 = scalar_lea.sflag [#allocation10], %s562_s5 }
  0xf7   : > { %978 = dma.done.wait (!%p749_p11), %s572_s8, 128  }
  0xf8   : > { %980 = vsyncadd (!%p749_p11), %s572_s8, 4294967168  ;;  %s1351_s26 = sld [smem:[#allocation15_spill]]  ;;  %p24_p5 = scmp.ge.s32.totalorder %s1058_s21, 4  }
  0xf9   : > { %s1352_s15 = smov %s987_s16  ;;  %s1353_s16 = smov %s991_s17 }
  0xfa   : > { %s1355_s18 = smov %s1058_s21  ;;  %26 = sbr.rel (!%p24_p5) target bundleno = 11 (0xb), region = 118 }
  0xfe   : > { %s1354_s17 = smov %s1351_s26 }
 0x101   :  { %577 = vsyncpa [#allocation3], 1 }
 0x102   :  { %579 = vsyncpa [#allocation3 + $0x1], 1 }
 0x103   :  { %580 = vsyncpa [#allocation6], 1 }
 0x104   :  { %582 = vsyncpa [#allocation6 + $0x1], 1 }
 0x105   :  { %583 = vsyncpa [#allocation4], 1 }
 0x106   :  { %585 = vsyncpa [#allocation4 + $0x1], 1 }
 0x107   :  { %586 = vsyncpa [#allocation10], 1 }
 0x108   :  { %588 = vsyncpa [#allocation10 + $0x1], 1 }

</bundles_post_ra>
